<compile_context>
chip_gen: v6e
topology: v6e:2x2x1
jax: 0.10.0
libtpu: 0.0.40
codegen_flags: <defaults>
</compile_context>

<pallas_src>
import functools

import jax
import jax.numpy as jnp
from jax.experimental import pallas as pl
from jax.experimental.pallas import tpu as pltpu


def _round_up(x, m):
    return ((x + m - 1) // m) * m


def _encoder_kernel(*refs, num_layers, dropout_rate):
    """Fused Encoder on one row tile.

    refs = [x_ref,
            w_0, b_0, ..., w_{L-1}, b_{L-1},
            (u_0, ..., u_{L-2}   # uniform [0,1) dropout draws, only if dropout on),
            o_ref]
    """
    apply_dropout = dropout_rate is not None and dropout_rate > 0.0

    x_ref = refs[0]
    w_refs = [refs[1 + 2 * l] for l in range(num_layers)]
    b_refs = [refs[2 + 2 * l] for l in range(num_layers)]
    n_wb = 1 + 2 * num_layers
    u_refs = list(refs[n_wb:n_wb + num_layers - 1]) if apply_dropout else []
    o_ref = refs[-1]

    scale = jnp.float32(1.0 / (1.0 - dropout_rate)) if apply_dropout else None

    h = x_ref[...]
    for l in range(num_layers - 1):
        # MXU matmul, f32 accumulate; epilogue (bias/ReLU/dropout) on the VPU.
        h = jnp.dot(h, w_refs[l][...], preferred_element_type=jnp.float32)
        h = h + b_refs[l][...]
        h = jnp.maximum(h, 0.0)
        if apply_dropout:
            keep = u_refs[l][...] >= jnp.float32(dropout_rate)
            h = jnp.where(keep, h * scale, 0.0)
    out = jnp.dot(h, w_refs[-1][...], preferred_element_type=jnp.float32)
    out = out + b_refs[-1][...]
    o_ref[...] = out.astype(o_ref.dtype)


def encoder_forward(x, params, *, dropout_rate=0.0, train=True, rng_key=None,
                    dropout_uniforms=None, tm=None):
    """Fused Pallas forward of Encoder.forward.

    params: list of (W, b), W: (in_features, out_features) (PyTorch weight.T),
            b: (out_features,) or (1, out_features).
    dropout_uniforms: optional list of L-1 arrays (M, out_features_l) of
            uniform [0,1) draws (for reproducible testing); generated from
            rng_key if not given.
    """
    M, K0 = x.shape
    num_layers = len(params)
    dims = [K0] + [w.shape[1] for w, _ in params]
    for l, (w, _) in enumerate(params):
        assert w.shape == (dims[l], dims[l + 1]), "layer dims must chain"

    # Lane-dense padding of every feature dim to a multiple of 128.
    dims_p = [_round_up(d, 128) for d in dims]

    # Row tiling: whole (row-padded) batch as one tile when small, else 512 rows.
    m8 = _round_up(M, 8)
    if tm is None:
        tm = m8 if m8 <= 512 else 512
    mp = _round_up(m8, tm)
    grid = (mp // tm,)

    dtype = x.dtype
    x_p = jnp.zeros((mp, dims_p[0]), dtype).at[:M, :K0].set(x)

    padded_params = []
    for l, (w, b) in enumerate(params):
        b2 = jnp.reshape(b, (1, -1)).astype(dtype)
        w_p = jnp.zeros((dims_p[l], dims_p[l + 1]), dtype)
        w_p = w_p.at[:dims[l], :dims[l + 1]].set(w.astype(dtype))
        b_p = jnp.zeros((1, dims_p[l + 1]), dtype).at[:, :dims[l + 1]].set(b2)
        padded_params.append((w_p, b_p))

    use_dropout = bool(train) and float(dropout_rate) > 0.0 and num_layers > 1
    u_padded = []
    if use_dropout:
        if dropout_uniforms is None:
            if rng_key is None:
                rng_key = jax.random.PRNGKey(0)
            keys = jax.random.split(rng_key, num_layers - 1)
            dropout_uniforms = [
                jax.random.uniform(keys[l], (M, dims[l + 1]), jnp.float32)
                for l in range(num_layers - 1)
            ]
        for l, u in enumerate(dropout_uniforms):
            # Pad with ones (always "kept"); padded lanes/rows are zero anyway.
            u_p = jnp.ones((mp, dims_p[l + 1]), jnp.float32)
            u_p = u_p.at[:M, :dims[l + 1]].set(u)
            u_padded.append(u_p)

    kernel = functools.partial(
        _encoder_kernel,
        num_layers=num_layers,
        dropout_rate=float(dropout_rate) if use_dropout else None,
    )

    # Specs: row tile of x, resident weights/biases, row tiles of dropout draws.
    in_specs = [pl.BlockSpec((tm, dims_p[0]), lambda i: (i, 0))]
    inputs = [x_p]
    for l in range(num_layers):
        in_specs.append(pl.BlockSpec((dims_p[l], dims_p[l + 1]), lambda i: (0, 0)))
        in_specs.append(pl.BlockSpec((1, dims_p[l + 1]), lambda i: (0, 0)))
        inputs.extend(padded_params[l])
    if use_dropout:
        for l in range(num_layers - 1):
            in_specs.append(pl.BlockSpec((tm, dims_p[l + 1]), lambda i: (i, 0)))
            inputs.append(u_padded[l])

    out_p = pl.pallas_call(
        kernel,
        out_shape=jax.ShapeDtypeStruct((mp, dims_p[-1]), dtype),
        grid_spec=pltpu.PrefetchScalarGridSpec(
            num_scalar_prefetch=0,
            grid=grid,
            in_specs=in_specs,
            out_specs=pl.BlockSpec((tm, dims_p[-1]), lambda i: (i, 0)),
        ),
        compiler_params=pltpu.CompilerParams(
            dimension_semantics=("parallel",),  # row tiles independent (megacore)
        ),
    )(*inputs)

    return out_p[:M, :dims[-1]]


def encoder_reference(x, params, *, dropout_rate=0.0, uniforms=None):
    """Pure-JAX reference. If uniforms given, applies the same dropout masks."""
    h = x
    for l, (w, b) in enumerate(params[:-1]):
        h = jnp.maximum(h @ w + jnp.reshape(b, (1, -1)), 0.0)
        if uniforms is not None:
            keep = uniforms[l] >= jnp.float32(dropout_rate)
            h = jnp.where(keep, h / (1.0 - dropout_rate), 0.0)
    w, b = params[-1]
    return h @ w + jnp.reshape(b, (1, -1))


if __name__ == "__main__":
    config = {"batchnorm": False, "dropout_rate": 0.1}
    layer_dims = [(32, 64), (64, 64), (64, 16)]  # (in_features, out_features)

    key = jax.random.PRNGKey(0)
    params = []
    for fin, fout in layer_dims:
        key, kw, kb = jax.random.split(key, 3)
        bound = 1.0 / (fin ** 0.5)  # nn.Linear default uniform init
        w = jax.random.uniform(kw, (fin, fout), jnp.float32, -bound, bound)
        b = jax.random.uniform(kb, (1, fout), jnp.float32, -bound, bound)
        params.append((w, b))

    key, kx = jax.random.split(key)
    x = jax.random.normal(kx, (128, 32), jnp.float32)  # [num_nodes, in_features]

    # ---- Eval mode: deterministic, compare against pure-JAX reference. ----
    out_eval = encoder_forward(
        x, params, dropout_rate=config["dropout_rate"], train=False
    )
    jax.block_until_ready(out_eval)
    ref_eval = encoder_reference(x, params)
    assert out_eval.shape == (128, 16)
    assert jnp.allclose(out_eval, ref_eval, atol=1e-5, rtol=1e-5), "eval mismatch"

    # ---- Train mode: same uniforms fed to kernel and reference -> exact match. ----
    key, k1, k2 = jax.random.split(key, 3)
    uniforms = [
        jax.random.uniform(k1, (128, 64), jnp.float32),
        jax.random.uniform(k2, (128, 64), jnp.float32),
    ]
    out_train = encoder_forward(
        x, params, dropout_rate=config["dropout_rate"], train=True,
        dropout_uniforms=uniforms,
    )
    jax.block_until_ready(out_train)
    ref_train = encoder_reference(
        x, params, dropout_rate=config["dropout_rate"], uniforms=uniforms
    )
    assert out_train.shape == (128, 16)
    assert jnp.allclose(out_train, ref_train, atol=1e-5, rtol=1e-5), "train mismatch"

    print("KERNEL_OK")
</pallas_src>

<mosaic_0001>
module attributes {stable_mosaic.version = 11 : i64} {
  func.func @_encoder_kernel(%arg0: i32, %arg1: memref<128x128xf32, #tpu.memory_space<vmem>>, %arg2: memref<128x128xf32, #tpu.memory_space<vmem>>, %arg3: memref<1x128xf32, #tpu.memory_space<vmem>>, %arg4: memref<128x128xf32, #tpu.memory_space<vmem>>, %arg5: memref<1x128xf32, #tpu.memory_space<vmem>>, %arg6: memref<128x128xf32, #tpu.memory_space<vmem>>, %arg7: memref<1x128xf32, #tpu.memory_space<vmem>>, %arg8: memref<128x128xf32, #tpu.memory_space<vmem>>) attributes {dimension_semantics = [#tpu.dimension_semantics<parallel>], iteration_bounds = array<i64: 1>, scalar_prefetch = 0 : i64, scratch_operands = 0 : i64, tpu.core_type = #tpu.core_type<tc>, window_params = [{transform_indices = @transform_0, window_bounds = array<i64: 128, 128>}, {pipeline_mode = #tpu.pipeline_mode<synchronous>, transform_indices = @transform_1, window_bounds = array<i64: 128, 128>}, {pipeline_mode = #tpu.pipeline_mode<synchronous>, transform_indices = @transform_2, window_bounds = array<i64: 1, 128>}, {pipeline_mode = #tpu.pipeline_mode<synchronous>, transform_indices = @transform_3, window_bounds = array<i64: 128, 128>}, {pipeline_mode = #tpu.pipeline_mode<synchronous>, transform_indices = @transform_4, window_bounds = array<i64: 1, 128>}, {pipeline_mode = #tpu.pipeline_mode<synchronous>, transform_indices = @transform_5, window_bounds = array<i64: 128, 128>}, {pipeline_mode = #tpu.pipeline_mode<synchronous>, transform_indices = @transform_6, window_bounds = array<i64: 1, 128>}, {transform_indices = @transform_7, window_bounds = array<i64: 128, 128>}]} {
    %c0 = arith.constant 0 : index
    %c0_0 = arith.constant 0 : index
    %0 = vector.load %arg1[%c0, %c0_0] : memref<128x128xf32, #tpu.memory_space<vmem>>, vector<128x128xf32>
    %c0_1 = arith.constant 0 : index
    %c0_2 = arith.constant 0 : index
    %1 = vector.load %arg2[%c0_1, %c0_2] : memref<128x128xf32, #tpu.memory_space<vmem>>, vector<128x128xf32>
    %cst = arith.constant dense<0.000000e+00> : vector<128x128xf32>
    %2 = tpu.matmul %0, %1, %cst {dimension_numbers = #tpu.dot_dimension_numbers<[1], [0], [0], [1], [0, 0, 1, 1], [], []>} : vector<128x128xf32>, vector<128x128xf32>, vector<128x128xf32> -> vector<128x128xf32>
    %c0_3 = arith.constant 0 : index
    %c0_4 = arith.constant 0 : index
    %3 = vector.load %arg3[%c0_3, %c0_4] : memref<1x128xf32, #tpu.memory_space<vmem>>, vector<1x128xf32>
    %4 = vector.broadcast %3 : vector<1x128xf32> to vector<128x128xf32>
    %5 = arith.addf %2, %4 : vector<128x128xf32>
    %cst_5 = arith.constant 0.000000e+00 : f32
    %6 = vector.broadcast %cst_5 : f32 to vector<128x128xf32>
    %7 = arith.maximumf %5, %6 : vector<128x128xf32>
    %c0_6 = arith.constant 0 : index
    %c0_7 = arith.constant 0 : index
    %8 = vector.load %arg4[%c0_6, %c0_7] : memref<128x128xf32, #tpu.memory_space<vmem>>, vector<128x128xf32>
    %cst_8 = arith.constant dense<0.000000e+00> : vector<128x128xf32>
    %9 = tpu.matmul %7, %8, %cst_8 {dimension_numbers = #tpu.dot_dimension_numbers<[1], [0], [0], [1], [0, 0, 1, 1], [], []>} : vector<128x128xf32>, vector<128x128xf32>, vector<128x128xf32> -> vector<128x128xf32>
    %c0_9 = arith.constant 0 : index
    %c0_10 = arith.constant 0 : index
    %10 = vector.load %arg5[%c0_9, %c0_10] : memref<1x128xf32, #tpu.memory_space<vmem>>, vector<1x128xf32>
    %11 = vector.broadcast %10 : vector<1x128xf32> to vector<128x128xf32>
    %12 = arith.addf %9, %11 : vector<128x128xf32>
    %cst_11 = arith.constant 0.000000e+00 : f32
    %13 = vector.broadcast %cst_11 : f32 to vector<128x128xf32>
    %14 = arith.maximumf %12, %13 : vector<128x128xf32>
    %c0_12 = arith.constant 0 : index
    %c0_13 = arith.constant 0 : index
    %15 = vector.load %arg6[%c0_12, %c0_13] : memref<128x128xf32, #tpu.memory_space<vmem>>, vector<128x128xf32>
    %cst_14 = arith.constant dense<0.000000e+00> : vector<128x128xf32>
    %16 = tpu.matmul %14, %15, %cst_14 {dimension_numbers = #tpu.dot_dimension_numbers<[1], [0], [0], [1], [0, 0, 1, 1], [], []>} : vector<128x128xf32>, vector<128x128xf32>, vector<128x128xf32> -> vector<128x128xf32>
    %c0_15 = arith.constant 0 : index
    %c0_16 = arith.constant 0 : index
    %17 = vector.load %arg7[%c0_15, %c0_16] : memref<1x128xf32, #tpu.memory_space<vmem>>, vector<1x128xf32>
    %18 = vector.broadcast %17 : vector<1x128xf32> to vector<128x128xf32>
    %19 = arith.addf %16, %18 : vector<128x128xf32>
    %c0_17 = arith.constant 0 : index
    %c0_18 = arith.constant 0 : index
    %20 = vector.load %arg8[%c0_17, %c0_18] : memref<128x128xf32, #tpu.memory_space<vmem>>, vector<128x128xf32>
    tpu.vector_store %arg8[%c0_17, %c0_18], %19 {strides = array<i32>} : memref<128x128xf32, #tpu.memory_space<vmem>>, vector<128x128xf32>,
    return
  }
  func.func @transform_0(%arg0: i32) -> (i32, i32) {
    %c0_i32 = arith.constant 0 : i32
    %c0_i32_0 = arith.constant 0 : i32
    return %arg0, %c0_i32 : i32, i32
  }
  func.func @transform_1(%arg0: i32) -> (i32, i32) {
    %c0_i32 = arith.constant 0 : i32
    %c0_i32_0 = arith.constant 0 : i32
    %c0_i32_1 = arith.constant 0 : i32
    return %c0_i32, %c0_i32_0 : i32, i32
  }
  func.func @transform_2(%arg0: i32) -> (i32, i32) {
    %c0_i32 = arith.constant 0 : i32
    %c0_i32_0 = arith.constant 0 : i32
    %c0_i32_1 = arith.constant 0 : i32
    return %c0_i32, %c0_i32_0 : i32, i32
  }
  func.func @transform_3(%arg0: i32) -> (i32, i32) {
    %c0_i32 = arith.constant 0 : i32
    %c0_i32_0 = arith.constant 0 : i32
    %c0_i32_1 = arith.constant 0 : i32
    return %c0_i32, %c0_i32_0 : i32, i32
  }
  func.func @transform_4(%arg0: i32) -> (i32, i32) {
    %c0_i32 = arith.constant 0 : i32
    %c0_i32_0 = arith.constant 0 : i32
    %c0_i32_1 = arith.constant 0 : i32
    return %c0_i32, %c0_i32_0 : i32, i32
  }
  func.func @transform_5(%arg0: i32) -> (i32, i32) {
    %c0_i32 = arith.constant 0 : i32
    %c0_i32_0 = arith.constant 0 : i32
    %c0_i32_1 = arith.constant 0 : i32
    return %c0_i32, %c0_i32_0 : i32, i32
  }
  func.func @transform_6(%arg0: i32) -> (i32, i32) {
    %c0_i32 = arith.constant 0 : i32
    %c0_i32_0 = arith.constant 0 : i32
    %c0_i32_1 = arith.constant 0 : i32
    return %c0_i32, %c0_i32_0 : i32, i32
  }
  func.func @transform_7(%arg0: i32) -> (i32, i32) {
    %c0_i32 = arith.constant 0 : i32
    %c0_i32_0 = arith.constant 0 : i32
    return %arg0, %c0_i32 : i32, i32
  }
}

</mosaic_0001>

<bundles_post_ra>
// kernel: tpu_custom_call.1
= control target key start
LH: loop header
LB: loop body
LE: loop exit
PB: predicated region body
PF: predicated region fallthrough
CT: control target
= control target key end

     0   :  { %12 = vsyncpa [#allocation3], 0  ;;  %s1235_s0 = inlined_call_operand.hbm [shape: f32[128,128], index: 0, kind: input, shape index: {}]   ;;  %s1236_s1 = inlined_call_operand.hbm [shape: f32[128,128], index: 1, kind: input, shape index: {}]   ;;  %s1237_s2 = inlined_call_operand.vmem [shape: f32[1,128], index: 2, kind: input, shape index: {}]   ;;  %s1238_s3 = inlined_call_operand.hbm [shape: f32[128,128], index: 3, kind: input, shape index: {}]   ;;  %s1239_s4 = inlined_call_operand.vmem [shape: f32[1,128], index: 4, kind: input, shape index: {}]   ;;  %s1240_s5 = inlined_call_operand.hbm [shape: f32[128,128], index: 5, kind: input, shape index: {}]   ;;  %s1241_s6 = inlined_call_operand.vmem [shape: f32[1,128], index: 6, kind: input, shape index: {}]   ;;  %s1242_s7 = inlined_call_operand.hbm [shape: f32[128,128], index: 7, kind: output, shape index: {}]  }
   0x1   :  { %13 = vsyncpa [#allocation6], 0 }
   0x2   :  { %14 = vsyncpa [#allocation9], 0 }
   0x3   :  { %15 = vsyncpa [#allocation4], 0  ;;  %s1083_s24 = smov [#allocation5]   ;;  %s1084_s26 = smov [#allocation2]  }
   0x4   :  { %s33_s25 = sshll.u32 %s1083_s24, 4  ;;  %s21_s27 = sshll.u32 %s1084_s26, 4  ;;  %s34_s25 = int_to_ptr.vmem [resolvable:$true] %s33_s25  ;;  %s22_s27 = int_to_ptr.vmem [resolvable:$true] %s21_s27 }
   0x5   :  { %s983_s28 = scalar_lea.vmem %s34_s25, 2048  ;;  %p988_p1 = scmp.lt.s32.totalorder %s34_s25, %s34_s25 }
   0x6   :  { %p984_p0 = scmp.ne.s32.totalorder %s34_s25, %s983_s28  ;;  %p989_p2 = scmp.lt.s32.totalorder %s983_s28, %s983_s28 }
   0x8   :  { %p990_p3 = por %p989_p2, %p988_p1 }
   0xa   :  { %p991_p4 = pnand %p990_p3, %p984_p0 }
   0xc   :  { %994 = shalt.err (!%p991_p4)
}
   0xd   :  { %s1085_s29 = smov 128   ;;  %s1086_s30 = smov 8  }
   0xe   :  { %39 = dma.hbm_to_vmem [thread:$0]  %s1236_s1, 2048, %s34_s25, [#allocation6], %s1085_s29, %s1085_s29, %s1086_s30  }
   0xf   :  { %s1003_s10 = scalar_lea.vmem %s22_s27, 2048  ;;  %p1008_p6 = scmp.lt.s32.totalorder %s22_s27, %s22_s27 }
  0x10   :  { %p1004_p5 = scmp.ne.s32.totalorder %s22_s27, %s1003_s10  ;;  %p1009_p7 = scmp.lt.s32.totalorder %s1003_s10, %s1003_s10 }
  0x12   :  { %p1010_p8 = por %p1009_p7, %p1008_p6 }
  0x14   :  { %p1011_p9 = pnand %p1010_p8, %p1004_p5 }
  0x16   :  { %1014 = shalt.err (!%p1011_p9)
}
  0x17   :  { %27 = dma.hbm_to_vmem [thread:$0]  %s1235_s0, 2048, %s22_s27, [#allocation3], %s1085_s29, %s1085_s29, %s1086_s30  }
  0x18   :  { %s1087_s13 = smov [#allocation7]   ;;  %s1088_s15 = smov [#allocation8]  }
  0x19   :  { %s47_s14 = sshll.u32 %s1087_s13, 4  ;;  %s61_s16 = sshll.u32 %s1088_s15, 4  ;;  %s48_s14 = int_to_ptr.vmem [resolvable:$true] %s47_s14  ;;  %s62_s16 = int_to_ptr.vmem [resolvable:$true] %s61_s16 }
  0x1a   :  { %s1023_s1 = scalar_lea.vmem %s48_s14, 2048  ;;  %p1028_p11 = scmp.lt.s32.totalorder %s48_s14, %s48_s14 }
  0x1b   :  { %p1024_p10 = scmp.ne.s32.totalorder %s48_s14, %s1023_s1  ;;  %p1029_p12 = scmp.lt.s32.totalorder %s1023_s1, %s1023_s1 }
  0x1d   :  { %p1030_p13 = por %p1029_p12, %p1028_p11 }
  0x1f   :  { %p1031_p0 = pnand %p1030_p13, %p1024_p10 }
  0x21   :  { %1034 = shalt.err (!%p1031_p0)
}
  0x22   :  { %53 = dma.hbm_to_vmem [thread:$0]  %s1238_s3, 2048, %s48_s14, [#allocation6], %s1085_s29, %s1085_s29, %s1086_s30  }
  0x23   :  { %s1043_s0 = scalar_lea.vmem %s62_s16, 2048  ;;  %p1048_p2 = scmp.lt.s32.totalorder %s62_s16, %s62_s16 }
  0x24   :  { %p1044_p1 = scmp.ne.s32.totalorder %s62_s16, %s1043_s0  ;;  %p1049_p3 = scmp.lt.s32.totalorder %s1043_s0, %s1043_s0 }
  0x26   :  { %p1050_p4 = por %p1049_p3, %p1048_p2 }
  0x28   :  { %p1051_p5 = pnand %p1050_p4, %p1044_p1 }
  0x2a   :  { %1054 = shalt.err (!%p1051_p5)
}
  0x2b   :  { %67 = dma.hbm_to_vmem [thread:$0]  %s1240_s5, 2048, %s62_s16, [#allocation9], %s1085_s29, %s1085_s29, %s1086_s30  }
  0x2c   :  { %1075 = dma.done.wait [#allocation3], 2048  }
  0x2d   :  { %1076 = vsyncadd [#allocation3], 4294965248 }
  0x2e   :  { %1077 = dma.done.wait [#allocation6], 4096  }
  0x2f   :  { %1078 = vsyncadd [#allocation6], 4294963200 }
  0x30   :  { %1079 = dma.done.wait [#allocation9], 2048  }
  0x31   :  { %1080 = vsyncadd [#allocation9], 4294965248  ;;  %v113_v0 = vld [vmem:[#allocation5 + $0x78] sm:$0xff]  ;;  %v112_v1 = vld [vmem:[#allocation5 + $0x70] sm:$0xff] }
  0x32   :  { %768 = vmatprep.subr.mxu0 %v113_v0  ;;  %v111_v2 = vld [vmem:[#allocation5 + $0x68] sm:$0xff]  ;;  %v110_v3 = vld [vmem:[#allocation5 + $0x60] sm:$0xff]  ;;  %v109_v5 = vld [vmem:[#allocation5 + $0x58] sm:$0xff] }
  0x33   :  { %769 = vmatpush3.msra.mxu0 %v113_v0  ;;  %v82_v4 = vld [vmem:[#allocation2] sm:$0xff]  ;;  %v108_v6 = vld [vmem:[#allocation5 + $0x50] sm:$0xff]  ;;  %v107_v7 = vld [vmem:[#allocation5 + $0x48] sm:$0xff] }
  0x34   :  { %770 = vmatprep.subr.mxu0 %v112_v1  ;;  %800 = vmatprep.mubr.f32.mxu0 %v82_v4  ;;  %v297_v8 = vld [vmem:[#allocation7 + $0x78] sm:$0xff]  ;;  %v296_v9 = vld [vmem:[#allocation7 + $0x70] sm:$0xff]  ;;  %v106_v10 = vld [vmem:[#allocation5 + $0x40] sm:$0xff] }
  0x35   :  { %771 = vmatpush3.msra.mxu0 %v112_v1  ;;  %824 = vmatprep.subr.mxu1 %v297_v8  ;;  %v295_v11 = vld [vmem:[#allocation7 + $0x68] sm:$0xff]  ;;  %v105_v12 = vld [vmem:[#allocation5 + $0x38] sm:$0xff]  ;;  %v294_v13 = vld [vmem:[#allocation7 + $0x60] sm:$0xff] }
  0x36   :  { %772 = vmatprep.subr.mxu0 %v111_v2  ;;  %825 = vmatpush3.msra.mxu1 %v297_v8  ;;  %v104_v14 = vld [vmem:[#allocation5 + $0x30] sm:$0xff]  ;;  %v293_v15 = vld [vmem:[#allocation7 + $0x58] sm:$0xff]  ;;  %v103_v16 = vld [vmem:[#allocation5 + $0x28] sm:$0xff] }
  0x37   :  { %773 = vmatpush3.msra.mxu0 %v111_v2  ;;  %826 = vmatprep.subr.mxu1 %v296_v9  ;;  %v292_v17 = vld [vmem:[#allocation7 + $0x50] sm:$0xff]  ;;  %v102_v18 = vld [vmem:[#allocation5 + $0x20] sm:$0xff]  ;;  %v291_v19 = vld [vmem:[#allocation7 + $0x48] sm:$0xff] }
  0x38   :  { %774 = vmatprep.subr.mxu0 %v110_v3  ;;  %827 = vmatpush3.msra.mxu1 %v296_v9  ;;  %v101_v20 = vld [vmem:[#allocation5 + $0x18] sm:$0xff]  ;;  %v290_v21 = vld [vmem:[#allocation7 + $0x40] sm:$0xff]  ;;  %v100_v22 = vld [vmem:[#allocation5 + $0x10] sm:$0xff] }
  0x39   :  { %775 = vmatpush3.msra.mxu0 %v110_v3  ;;  %828 = vmatprep.subr.mxu1 %v295_v11  ;;  %v289_v23 = vld [vmem:[#allocation7 + $0x38] sm:$0xff]  ;;  %v99_v24 = vld [vmem:[#allocation5 + $0x8] sm:$0xff]  ;;  %v288_v25 = vld [vmem:[#allocation7 + $0x30] sm:$0xff] }
  0x3a   :  { %776 = vmatprep.subr.mxu0 %v109_v5  ;;  %829 = vmatpush3.msra.mxu1 %v295_v11  ;;  %v98_v26 = vld [vmem:[#allocation5] sm:$0xff]  ;;  %v287_v27 = vld [vmem:[#allocation7 + $0x28] sm:$0xff]  ;;  %v84_v30 = vld [vmem:[#allocation2 + $0x10] sm:$0xff] }
  0x3b   :  { %777 = vmatpush3.msra.mxu0 %v109_v5  ;;  %830 = vmatprep.subr.mxu1 %v294_v13  ;;  %v83_v28 = vld [vmem:[#allocation2 + $0x8] sm:$0xff]  ;;  %v286_v29 = vld [vmem:[#allocation7 + $0x20] sm:$0xff]  ;;  %v85_v31 = vld [vmem:[#allocation2 + $0x18] sm:$0xff] }
  0x3c   :  { %778 = vmatprep.subr.mxu0 %v108_v6  ;;  %831 = vmatpush3.msra.mxu1 %v294_v13  ;;  %v86_v32 = vld [vmem:[#allocation2 + $0x20] sm:$0xff]  ;;  %v87_v33 = vld [vmem:[#allocation2 + $0x28] sm:$0xff]  ;;  %v88_v34 = vld [vmem:[#allocation2 + $0x30] sm:$0xff] }
  0x3d   :  { %779 = vmatpush3.msra.mxu0 %v108_v6  ;;  %832 = vmatprep.subr.mxu1 %v293_v15  ;;  %v89_v35 = vld [vmem:[#allocation2 + $0x38] sm:$0xff]  ;;  %v90_v36 = vld [vmem:[#allocation2 + $0x40] sm:$0xff]  ;;  %v91_v37 = vld [vmem:[#allocation2 + $0x48] sm:$0xff] }
  0x3e   :  { %780 = vmatprep.subr.mxu0 %v107_v7  ;;  %833 = vmatpush3.msra.mxu1 %v293_v15  ;;  %v92_v38 = vld [vmem:[#allocation2 + $0x50] sm:$0xff]  ;;  %v93_v39 = vld [vmem:[#allocation2 + $0x58] sm:$0xff]  ;;  %v94_v40 = vld [vmem:[#allocation2 + $0x60] sm:$0xff] }
  0x3f   :  { %781 = vmatpush3.msra.mxu0 %v107_v7  ;;  %834 = vmatprep.subr.mxu1 %v292_v17  ;;  %v95_v41 = vld [vmem:[#allocation2 + $0x68] sm:$0xff]  ;;  %v96_v42 = vld [vmem:[#allocation2 + $0x70] sm:$0xff]  ;;  %v97_v43 = vld [vmem:[#allocation2 + $0x78] sm:$0xff] }
  0x40   :  { %782 = vmatprep.subr.mxu0 %v106_v10  ;;  %835 = vmatpush3.msra.mxu1 %v292_v17  ;;  %v285_v44 = vld [vmem:[#allocation7 + $0x18] sm:$0xff]  ;;  %v284_v45 = vld [vmem:[#allocation7 + $0x10] sm:$0xff]  ;;  %v283_v46 = vld [vmem:[#allocation7 + $0x8] sm:$0xff] }
  0x41   :  { %783 = vmatpush3.msra.mxu0 %v106_v10  ;;  %836 = vmatprep.subr.mxu1 %v291_v19  ;;  %v282_v47 = vld [vmem:[#allocation7] sm:$0xff]  ;;  %v481_v48 = vld [vmem:[#allocation8 + $0x78] sm:$0xff]  ;;  %v480_v49 = vld [vmem:[#allocation8 + $0x70] sm:$0xff] }
  0x42   :  { %784 = vmatprep.subr.mxu0 %v105_v12  ;;  %837 = vmatpush3.msra.mxu1 %v291_v19  ;;  %v479_v50 = vld [vmem:[#allocation8 + $0x68] sm:$0xff]  ;;  %v478_v51 = vld [vmem:[#allocation8 + $0x60] sm:$0xff]  ;;  %v1154_v52 = vld [vmem:[#allocation8 + $0x58] sm:$0xff] }
  0x43   :  { %785 = vmatpush3.msra.mxu0 %v105_v12  ;;  %838 = vmatprep.subr.mxu1 %v290_v21  ;;  %v1156_v53 = vld [vmem:[#allocation8 + $0x50] sm:$0xff]  ;;  %v1160_v54 = vld [vmem:[#allocation8 + $0x48] sm:$0xff]  ;;  %v1164_v55 = vld [vmem:[#allocation8 + $0x40] sm:$0xff] }
  0x44   :  { %786 = vmatprep.subr.mxu0 %v104_v14  ;;  %839 = vmatpush3.msra.mxu1 %v290_v21  ;;  %v1168_v56 = vld [vmem:[#allocation8 + $0x38] sm:$0xff]  ;;  %v1172_v57 = vld [vmem:[#allocation8 + $0x30] sm:$0xff]  ;;  %v1176_v58 = vld [vmem:[#allocation8 + $0x28] sm:$0xff] }
  0x45   :  { %787 = vmatpush3.msra.mxu0 %v104_v14  ;;  %840 = vmatprep.subr.mxu1 %v289_v23  ;;  %v1180_v59 = vld [vmem:[#allocation8 + $0x20] sm:$0xff] }
  0x46   :  { %788 = vmatprep.subr.mxu0 %v103_v16  ;;  %841 = vmatpush3.msra.mxu1 %v289_v23  ;;  %v1189_v60 = vld [vmem:[%s1237_s2] ss:$0 sm:$0xff] }
  0x47   :  { %789 = vmatpush3.msra.mxu0 %v103_v16  ;;  %842 = vmatprep.subr.mxu1 %v288_v25 }
  0x48   :  { %790 = vmatprep.subr.mxu0 %v102_v18  ;;  %843 = vmatpush3.msra.mxu1 %v288_v25 }
  0x49   :  { %791 = vmatpush3.msra.mxu0 %v102_v18  ;;  %844 = vmatprep.subr.mxu1 %v287_v27 }
  0x4a   :  { %792 = vmatprep.subr.mxu0 %v101_v20  ;;  %845 = vmatpush3.msra.mxu1 %v287_v27 }
  0x4b   :  { %793 = vmatpush3.msra.mxu0 %v101_v20  ;;  %846 = vmatprep.subr.mxu1 %v286_v29 }
  0x4c   :  { %794 = vmatprep.subr.mxu0 %v100_v22  ;;  %847 = vmatpush3.msra.mxu1 %v286_v29 }
  0x4d   :  { %795 = vmatpush3.msra.mxu0 %v100_v22  ;;  %848 = vmatprep.subr.mxu1 %v285_v44 }
  0x4e   :  { %796 = vmatprep.subr.mxu0 %v99_v24  ;;  %849 = vmatpush3.msra.mxu1 %v285_v44 }
  0x4f   :  { %797 = vmatpush3.msra.mxu0 %v99_v24  ;;  %850 = vmatprep.subr.mxu1 %v284_v45 }
  0x50   :  { %798 = vmatprep.subr.mxu0 %v98_v26  ;;  %851 = vmatpush3.msra.mxu1 %v284_v45  ;;  %v469_v45 = vld [vmem:[#allocation8 + $0x18] sm:$0xff] }
  0x51   :  { %799 = vmatpush3.msra.mxu0 %v98_v26  ;;  %852 = vmatprep.subr.mxu1 %v283_v46 }
  0x52   :  { %801 = vmatmul.mubr.f32.vlgmr.msra.gmra.mxu0 %v83_v28  ;;  %853 = vmatpush3.msra.mxu1 %v283_v46  ;;  %v468_v46 = vld [vmem:[#allocation8 + $0x10] sm:$0xff] }
  0x53   :  { %803 = vmatprep.mubr.f32.mxu0 %v84_v30  ;;  %854 = vmatprep.subr.mxu1 %v282_v47 }
  0x54   :  { %855 = vmatpush3.msra.mxu1 %v282_v47  ;;  %880 = vmatprep.subr.mxu0 %v481_v48  ;;  %v467_v47 = vld [vmem:[#allocation8 + $0x8] sm:$0xff] }
  0x55   :  { %936 = vmatprep.subr.mxu1 %v481_v48  ;;  %881 = vmatpush3.msra.mxu0 %v481_v48 }
  0x56   :  { %804 = vmatmul.mubr.f32.gmra.mxu0 %v85_v31  ;;  %882 = vmatprep.subr.mxu0 %v480_v49 }
  0x57   :  { %806 = vmatprep.mubr.f32.mxu0 %v86_v32  ;;  %883 = vmatpush3.msra.mxu0 %v480_v49 }
  0x58   :  { %884 = vmatprep.subr.mxu0 %v479_v50 }
  0x59   :  { %885 = vmatpush3.msra.mxu0 %v479_v50 }
  0x5a   :  { %807 = vmatmul.mubr.f32.gmra.mxu0 %v87_v33  ;;  %886 = vmatprep.subr.mxu0 %v478_v51 }
  0x5b   :  { %809 = vmatprep.mubr.f32.mxu0 %v88_v34  ;;  %887 = vmatpush3.msra.mxu0 %v478_v51 }
  0x5c   :  { %888 = vmatprep.subr.mxu0 %v1154_v52 }
  0x5d   :  { %889 = vmatpush3.msra.mxu0 %v1154_v52 }
  0x5e   :  { %810 = vmatmul.mubr.f32.gmra.mxu0 %v89_v35  ;;  %890 = vmatprep.subr.mxu0 %v1156_v53 }
  0x5f   :  { %812 = vmatprep.mubr.f32.mxu0 %v90_v36  ;;  %891 = vmatpush3.msra.mxu0 %v1156_v53 }
  0x60   :  { %892 = vmatprep.subr.mxu0 %v1160_v54 }
  0x61   :  { %893 = vmatpush3.msra.mxu0 %v1160_v54 }
  0x62   :  { %813 = vmatmul.mubr.f32.gmra.mxu0 %v91_v37  ;;  %894 = vmatprep.subr.mxu0 %v1164_v55 }
  0x63   :  { %815 = vmatprep.mubr.f32.mxu0 %v92_v38  ;;  %895 = vmatpush3.msra.mxu0 %v1164_v55 }
  0x64   :  { %896 = vmatprep.subr.mxu0 %v1168_v56 }
  0x65   :  { %897 = vmatpush3.msra.mxu0 %v1168_v56 }
  0x66   :  { %816 = vmatmul.mubr.f32.gmra.mxu0 %v93_v39  ;;  %898 = vmatprep.subr.mxu0 %v1172_v57 }
  0x67   :  { %818 = vmatprep.mubr.f32.mxu0 %v94_v40  ;;  %899 = vmatpush3.msra.mxu0 %v1172_v57 }
  0x68   :  { %900 = vmatprep.subr.mxu0 %v1176_v58 }
  0x69   :  { %901 = vmatpush3.msra.mxu0 %v1176_v58 }
  0x6a   :  { %819 = vmatmul.mubr.f32.gmra.mxu0 %v95_v41  ;;  %902 = vmatprep.subr.mxu0 %v1180_v59 }
  0x6b   :  { %821 = vmatprep.mubr.f32.mxu0 %v96_v42  ;;  %903 = vmatpush3.msra.mxu0 %v1180_v59 }
  0x6c   :  { %904 = vmatprep.subr.mxu0 %v469_v45 }
  0x6d   :  { %905 = vmatpush3.msra.mxu0 %v469_v45 }
  0x6e   :  { %822 = vmatmul.mubr.f32.gmra.mxu0 %v97_v43  ;;  %906 = vmatprep.subr.mxu0 %v468_v46 }
  0x6f   :  { %907 = vmatpush3.msra.mxu0 %v468_v46 }
  0x70   :  { %908 = vmatprep.subr.mxu0 %v467_v47 }
  0x71   :  { %909 = vmatpush3.msra.mxu0 %v467_v47 }
 0x112   :  { %v802_v61 = vpop.f32.mrf.mxu0 }
 0x113   :  { %v193_v62 = vadd.f32 %v802_v61, %v1189_v60 }
 0x114   :  { %v187_v63 = vpop.f32.mrf.mxu0 }
 0x115   :  { %v188_v0 = vadd.f32 %v1189_v60, %v187_v63  ;;  %v267_v3 = vmax.f32 %v193_v62, 0.0 }
 0x116   :  { %v805_v1 = vpop.f32.mrf.mxu0 }
 0x117   :  { %v266_v2 = vmax.f32 %v188_v0, 0.0  ;;  %v203_v4 = vadd.f32 %v805_v1, %v1189_v60 }
 0x118   :  { %v197_v5 = vpop.f32.mrf.mxu0 }
 0x119   :  { %v198_v6 = vadd.f32 %v1189_v60, %v197_v5  ;;  %856 = vmatprep.mubr.f32.mxu1 %v266_v2  ;;  %v269_v9 = vmax.f32 %v203_v4, 0.0 }
 0x11a   :  { %v808_v7 = vpop.f32.mrf.mxu0  ;;  %857 = vmatmul.mubr.f32.vlgmr.msra.gmra.mxu1 %v267_v3 }
 0x11b   :  { %v268_v8 = vmax.f32 %v198_v6, 0.0  ;;  %952 = vmatpush3.msra.mxu1 %v481_v48  ;;  %v213_v10 = vadd.f32 %v808_v7, %v1189_v60  ;;  %v466_v48 = vld [vmem:[#allocation8] sm:$0xff] }
 0x11c   :  { %v207_v11 = vpop.f32.mrf.mxu0  ;;  %937 = vmatprep.subr.mxu1 %v480_v49  ;;  %910 = vmatprep.subr.mxu0 %v466_v48 }
 0x11d   :  { %v208_v12 = vadd.f32 %v1189_v60, %v207_v11  ;;  %859 = vmatprep.mubr.f32.mxu1 %v268_v8  ;;  %953 = vmatpush3.msra.mxu1 %v480_v49  ;;  %v271_v15 = vmax.f32 %v213_v10, 0.0  ;;  %v670_v49 = vld [vmem:[%s1239_s4] ss:$0 sm:$0xff] }
 0x11e   :  { %v811_v13 = vpop.f32.mrf.mxu0  ;;  %860 = vmatmul.mubr.f32.gmra.mxu1 %v269_v9  ;;  %938 = vmatprep.subr.mxu1 %v479_v50 }
 0x11f   :  { %v270_v14 = vmax.f32 %v208_v12, 0.0  ;;  %954 = vmatpush3.msra.mxu1 %v479_v50  ;;  %v223_v16 = vadd.f32 %v811_v13, %v1189_v60  ;;  %911 = vmatpush3.msra.mxu0 %v466_v48 }
 0x120   :  { %v217_v17 = vpop.f32.mrf.mxu0  ;;  %939 = vmatprep.subr.mxu1 %v478_v51 }
 0x121   :  { %v218_v18 = vadd.f32 %v1189_v60, %v217_v17  ;;  %862 = vmatprep.mubr.f32.mxu1 %v270_v14  ;;  %955 = vmatpush3.msra.mxu1 %v478_v51  ;;  %v273_v21 = vmax.f32 %v223_v16, 0.0 }
 0x122   :  { %v814_v19 = vpop.f32.mrf.mxu0  ;;  %863 = vmatmul.mubr.f32.gmra.mxu1 %v271_v15  ;;  %940 = vmatprep.subr.mxu1 %v1154_v52 }
 0x123   :  { %v272_v20 = vmax.f32 %v218_v18, 0.0  ;;  %956 = vmatpush3.msra.mxu1 %v1154_v52  ;;  %v233_v22 = vadd.f32 %v814_v19, %v1189_v60 }
 0x124   :  { %v227_v23 = vpop.f32.mrf.mxu0  ;;  %941 = vmatprep.subr.mxu1 %v1156_v53 }
 0x125   :  { %v228_v24 = vadd.f32 %v1189_v60, %v227_v23  ;;  %865 = vmatprep.mubr.f32.mxu1 %v272_v20  ;;  %957 = vmatpush3.msra.mxu1 %v1156_v53  ;;  %v275_v27 = vmax.f32 %v233_v22, 0.0 }
 0x126   :  { %v817_v25 = vpop.f32.mrf.mxu0  ;;  %866 = vmatmul.mubr.f32.gmra.mxu1 %v273_v21  ;;  %942 = vmatprep.subr.mxu1 %v1160_v54 }
 0x127   :  { %v274_v26 = vmax.f32 %v228_v24, 0.0  ;;  %958 = vmatpush3.msra.mxu1 %v1160_v54  ;;  %v243_v28 = vadd.f32 %v817_v25, %v1189_v60 }
 0x128   :  { %v237_v29 = vpop.f32.mrf.mxu0  ;;  %943 = vmatprep.subr.mxu1 %v1164_v55 }
 0x129   :  { %v238_v30 = vadd.f32 %v1189_v60, %v237_v29  ;;  %868 = vmatprep.mubr.f32.mxu1 %v274_v26  ;;  %959 = vmatpush3.msra.mxu1 %v1164_v55  ;;  %v277_v33 = vmax.f32 %v243_v28, 0.0 }
 0x12a   :  { %v820_v31 = vpop.f32.mrf.mxu0  ;;  %869 = vmatmul.mubr.f32.gmra.mxu1 %v275_v27  ;;  %944 = vmatprep.subr.mxu1 %v1168_v56 }
 0x12b   :  { %v276_v32 = vmax.f32 %v238_v30, 0.0  ;;  %960 = vmatpush3.msra.mxu1 %v1168_v56  ;;  %v253_v34 = vadd.f32 %v820_v31, %v1189_v60 }
 0x12c   :  { %v247_v35 = vpop.f32.mrf.mxu0  ;;  %945 = vmatprep.subr.mxu1 %v1172_v57 }
 0x12d   :  { %v248_v36 = vadd.f32 %v1189_v60, %v247_v35  ;;  %871 = vmatprep.mubr.f32.mxu1 %v276_v32  ;;  %961 = vmatpush3.msra.mxu1 %v1172_v57  ;;  %v279_v39 = vmax.f32 %v253_v34, 0.0  ;;  %v671_v34 = vld [vmem:[%s1241_s6] ss:$0 sm:$0xff]  ;;  %s1089_s6 = smov [#allocation10]  }
 0x12e   :  { %v823_v37 = vpop.f32.mrf.mxu0  ;;  %872 = vmatmul.mubr.f32.gmra.mxu1 %v277_v33  ;;  %946 = vmatprep.subr.mxu1 %v1176_v58  ;;  %s655_s23 = sshll.u32 %s1089_s6, 4  ;;  %s656_s23 = int_to_ptr.vmem [resolvable:$true] %s655_s23 }
 0x12f   :  { %v278_v38 = vmax.f32 %v248_v36, 0.0  ;;  %962 = vmatpush3.msra.mxu1 %v1176_v58  ;;  %v263_v40 = vadd.f32 %v823_v37, %v1189_v60  ;;  %s1055_s24 = scalar_lea.vmem %s656_s23, 2048  ;;  %p1060_p7 = scmp.lt.s32.totalorder %s656_s23, %s656_s23 }
 0x130   :  { %v257_v41 = vpop.f32.mrf.mxu0  ;;  %947 = vmatprep.subr.mxu1 %v1180_v59  ;;  %p1056_p6 = scmp.ne.s32.totalorder %s656_s23, %s1055_s24  ;;  %p1061_p8 = scmp.lt.s32.totalorder %s1055_s24, %s1055_s24 }
 0x131   :  { %v258_v42 = vadd.f32 %v1189_v60, %v257_v41  ;;  %874 = vmatprep.mubr.f32.mxu1 %v278_v38  ;;  %963 = vmatpush3.msra.mxu1 %v1180_v59  ;;  %v281_v44 = vmax.f32 %v263_v40, 0.0 }
 0x132   :  { %875 = vmatmul.mubr.f32.gmra.mxu1 %v279_v39  ;;  %948 = vmatprep.subr.mxu1 %v469_v45  ;;  %p1062_p9 = por %p1061_p8, %p1060_p7 }
 0x133   :  { %v280_v43 = vmax.f32 %v258_v42, 0.0  ;;  %964 = vmatpush3.msra.mxu1 %v469_v45 }
 0x134   :  { %949 = vmatprep.subr.mxu1 %v468_v46  ;;  %p1063_p10 = pnand %p1062_p9, %p1056_p6 }
 0x135   :  { %877 = vmatprep.mubr.f32.mxu1 %v280_v43  ;;  %965 = vmatpush3.msra.mxu1 %v468_v46 }
 0x136   :  { %878 = vmatmul.mubr.f32.gmra.mxu1 %v281_v44  ;;  %950 = vmatprep.subr.mxu1 %v467_v47 }
 0x137   :  { %966 = vmatpush3.msra.mxu1 %v467_v47 }
 0x138   :  { %951 = vmatprep.subr.mxu1 %v466_v48 }
 0x139   :  { %967 = vmatpush3.msra.mxu1 %v466_v48 }
 0x1da   :  { %v858_v50 = vpop.f32.mrf.mxu1 }
 0x1db   :  { %v377_v51 = vadd.f32 %v858_v50, %v670_v49 }
 0x1dc   :  { %v371_v52 = vpop.f32.mrf.mxu1 }
 0x1dd   :  { %v372_v53 = vadd.f32 %v670_v49, %v371_v52  ;;  %v451_v56 = vmax.f32 %v377_v51, 0.0 }
 0x1de   :  { %v861_v54 = vpop.f32.mrf.mxu1 }
 0x1df   :  { %v450_v55 = vmax.f32 %v372_v53, 0.0  ;;  %v387_v57 = vadd.f32 %v861_v54, %v670_v49 }
 0x1e0   :  { %v381_v58 = vpop.f32.mrf.mxu1 }
 0x1e1   :  { %v382_v59 = vadd.f32 %v670_v49, %v381_v58  ;;  %912 = vmatprep.mubr.f32.mxu0 %v450_v55  ;;  %v453_v62 = vmax.f32 %v387_v57, 0.0 }
 0x1e2   :  { %v864_v60 = vpop.f32.mrf.mxu1  ;;  %913 = vmatmul.mubr.f32.vlgmr.msra.gmra.mxu0 %v451_v56 }
 0x1e3   :  { %v452_v61 = vmax.f32 %v382_v59, 0.0  ;;  %v397_v63 = vadd.f32 %v864_v60, %v670_v49 }
 0x1e4   :  { %v391_v0 = vpop.f32.mrf.mxu1 }
 0x1e5   :  { %v392_v1 = vadd.f32 %v670_v49, %v391_v0  ;;  %915 = vmatprep.mubr.f32.mxu0 %v452_v61  ;;  %v455_v4 = vmax.f32 %v397_v63, 0.0 }
 0x1e6   :  { %v867_v2 = vpop.f32.mrf.mxu1  ;;  %916 = vmatmul.mubr.f32.gmra.mxu0 %v453_v62 }
 0x1e7   :  { %v454_v3 = vmax.f32 %v392_v1, 0.0  ;;  %v407_v5 = vadd.f32 %v867_v2, %v670_v49 }
 0x1e8   :  { %v401_v6 = vpop.f32.mrf.mxu1 }
 0x1e9   :  { %v402_v7 = vadd.f32 %v670_v49, %v401_v6  ;;  %918 = vmatprep.mubr.f32.mxu0 %v454_v3  ;;  %v457_v10 = vmax.f32 %v407_v5, 0.0 }
 0x1ea   :  { %v870_v8 = vpop.f32.mrf.mxu1  ;;  %919 = vmatmul.mubr.f32.gmra.mxu0 %v455_v4 }
 0x1eb   :  { %v456_v9 = vmax.f32 %v402_v7, 0.0  ;;  %v417_v11 = vadd.f32 %v870_v8, %v670_v49 }
 0x1ec   :  { %v411_v12 = vpop.f32.mrf.mxu1 }
 0x1ed   :  { %v412_v13 = vadd.f32 %v670_v49, %v411_v12  ;;  %921 = vmatprep.mubr.f32.mxu0 %v456_v9  ;;  %v459_v16 = vmax.f32 %v417_v11, 0.0 }
 0x1ee   :  { %v873_v14 = vpop.f32.mrf.mxu1  ;;  %922 = vmatmul.mubr.f32.gmra.mxu0 %v457_v10 }
 0x1ef   :  { %v458_v15 = vmax.f32 %v412_v13, 0.0  ;;  %v427_v17 = vadd.f32 %v873_v14, %v670_v49 }
 0x1f0   :  { %v421_v18 = vpop.f32.mrf.mxu1 }
 0x1f1   :  { %v422_v19 = vadd.f32 %v670_v49, %v421_v18  ;;  %924 = vmatprep.mubr.f32.mxu1 %v458_v15  ;;  %v461_v22 = vmax.f32 %v427_v17, 0.0 }
 0x1f2   :  { %v876_v20 = vpop.f32.mrf.mxu1  ;;  %925 = vmatmul.mubr.f32.vlgmr.msra.gmra.mxu1 %v459_v16 }
 0x1f3   :  { %v460_v21 = vmax.f32 %v422_v19, 0.0  ;;  %v437_v23 = vadd.f32 %v876_v20, %v670_v49 }
 0x1f4   :  { %v431_v24 = vpop.f32.mrf.mxu1 }
 0x1f5   :  { %v432_v25 = vadd.f32 %v670_v49, %v431_v24  ;;  %927 = vmatprep.mubr.f32.mxu1 %v460_v21  ;;  %v463_v28 = vmax.f32 %v437_v23, 0.0 }
 0x1f6   :  { %v879_v26 = vpop.f32.mrf.mxu1  ;;  %928 = vmatmul.mubr.f32.gmra.mxu1 %v461_v22 }
 0x1f7   :  { %v462_v27 = vmax.f32 %v432_v25, 0.0  ;;  %v447_v29 = vadd.f32 %v879_v26, %v670_v49 }
 0x1f8   :  { %v441_v30 = vpop.f32.mrf.mxu1 }
 0x1f9   :  { %v442_v31 = vadd.f32 %v670_v49, %v441_v30  ;;  %930 = vmatprep.mubr.f32.mxu1 %v462_v27  ;;  %v465_v33 = vmax.f32 %v447_v29, 0.0 }
 0x1fa   :  { %931 = vmatmul.mubr.f32.gmra.mxu1 %v463_v28 }
 0x1fb   :  { %v464_v32 = vmax.f32 %v442_v31, 0.0 }
 0x1fd   :  { %933 = vmatprep.mubr.f32.mxu1 %v464_v32 }
 0x1fe   :  { %934 = vmatmul.mubr.f32.gmra.mxu1 %v465_v33 }
 0x2a2   :  { %v914_v35 = vpop.f32.mrf.mxu0 }
 0x2a3   :  { %v561_v36 = vadd.f32 %v914_v35, %v671_v34 }
 0x2a4   :  { %v555_v37 = vpop.f32.mrf.mxu0 }
 0x2a5   :  { %635 = vst [vmem:[#allocation10 + $0x8] sm:$0xff] %v561_v36  ;;  %v556_v38 = vadd.f32 %v671_v34, %v555_v37 }
 0x2a6   :  { %v917_v39 = vpop.f32.mrf.mxu0 }
 0x2a7   :  { %634 = vst [vmem:[#allocation10] sm:$0xff] %v556_v38  ;;  %v571_v40 = vadd.f32 %v917_v39, %v671_v34 }
 0x2a8   :  { %v565_v41 = vpop.f32.mrf.mxu0 }
 0x2a9   :  { %637 = vst [vmem:[#allocation10 + $0x18] sm:$0xff] %v571_v40  ;;  %v566_v42 = vadd.f32 %v671_v34, %v565_v41 }
 0x2aa   :  { %v920_v43 = vpop.f32.mrf.mxu0 }
 0x2ab   :  { %636 = vst [vmem:[#allocation10 + $0x10] sm:$0xff] %v566_v42  ;;  %v581_v44 = vadd.f32 %v920_v43, %v671_v34 }
 0x2ac   :  { %v575_v45 = vpop.f32.mrf.mxu0 }
 0x2ad   :  { %639 = vst [vmem:[#allocation10 + $0x28] sm:$0xff] %v581_v44  ;;  %v576_v46 = vadd.f32 %v671_v34, %v575_v45 }
 0x2ae   :  { %v923_v47 = vpop.f32.mrf.mxu0 }
 0x2af   :  { %638 = vst [vmem:[#allocation10 + $0x20] sm:$0xff] %v576_v46  ;;  %v591_v48 = vadd.f32 %v923_v47, %v671_v34 }
 0x2b0   :  { %v585_v49 = vpop.f32.mrf.mxu0 }
 0x2b1   :  { %641 = vst [vmem:[#allocation10 + $0x38] sm:$0xff] %v591_v48  ;;  %v586_v50 = vadd.f32 %v671_v34, %v585_v49 }
 0x2b2   :  { %v926_v51 = vpop.f32.mrf.mxu1 }
 0x2b3   :  { %640 = vst [vmem:[#allocation10 + $0x30] sm:$0xff] %v586_v50  ;;  %v601_v52 = vadd.f32 %v926_v51, %v671_v34 }
 0x2b4   :  { %v595_v53 = vpop.f32.mrf.mxu1 }
 0x2b5   :  { %643 = vst [vmem:[#allocation10 + $0x48] sm:$0xff] %v601_v52  ;;  %v596_v54 = vadd.f32 %v671_v34, %v595_v53 }
 0x2b6   :  { %v929_v55 = vpop.f32.mrf.mxu1 }
 0x2b7   :  { %642 = vst [vmem:[#allocation10 + $0x40] sm:$0xff] %v596_v54  ;;  %v611_v56 = vadd.f32 %v929_v55, %v671_v34 }
 0x2b8   :  { %v605_v57 = vpop.f32.mrf.mxu1 }
 0x2b9   :  { %645 = vst [vmem:[#allocation10 + $0x58] sm:$0xff] %v611_v56  ;;  %v606_v58 = vadd.f32 %v671_v34, %v605_v57 }
 0x2ba   :  { %v932_v59 = vpop.f32.mrf.mxu1 }
 0x2bb   :  { %644 = vst [vmem:[#allocation10 + $0x50] sm:$0xff] %v606_v58  ;;  %v621_v60 = vadd.f32 %v932_v59, %v671_v34 }
 0x2bc   :  { %v615_v61 = vpop.f32.mrf.mxu1 }
 0x2bd   :  { %647 = vst [vmem:[#allocation10 + $0x68] sm:$0xff] %v621_v60  ;;  %v616_v62 = vadd.f32 %v671_v34, %v615_v61 }
 0x2be   :  { %v935_v63 = vpop.f32.mrf.mxu1 }
 0x2bf   :  { %646 = vst [vmem:[#allocation10 + $0x60] sm:$0xff] %v616_v62  ;;  %v631_v0 = vadd.f32 %v935_v63, %v671_v34 }
 0x2c0   :  { %v625_v1 = vpop.f32.mrf.mxu1 }
 0x2c1   :  { %649 = vst [vmem:[#allocation10 + $0x78] sm:$0xff] %v631_v0  ;;  %v626_v2 = vadd.f32 %v671_v34, %v625_v1 }
 0x2c3   :  { %648 = vst [vmem:[#allocation10 + $0x70] sm:$0xff] %v626_v2 }
 0x2c4   :  { %1066 = shalt.err (!%p1063_p10)
}
 0x2c5   :  { %661 = dma.vmem_to_hbm [thread:$0]  %s656_s23, 2048, %s1242_s7, [#allocation4], %s1085_s29, %s1085_s29, %s1086_s30  }
 0x2c6   :  { %1081 = dma.done.wait [#allocation4], 2048  }
 0x2c7   :  { %1082 = vsyncadd [#allocation4], 4294965248 }
 0x2c8   :  { %665 = vsyncpa [#allocation3], 1 }
 0x2c9   :  { %666 = vsyncpa [#allocation6], 1 }
 0x2ca   :  { %667 = vsyncpa [#allocation9], 1 }
 0x2cb   :  { %668 = vsyncpa [#allocation4], 1 }

</bundles_post_ra>
